<compile_context>
chip_gen: v7x
topology: tpu7x:2x2x1
jax: 0.10.0
libtpu: 0.0.40
codegen_flags: <defaults>
</compile_context>

<pallas_src>
import functools

import jax
import jax.numpy as jnp
from jax.experimental import pallas as pl
from jax.experimental.pallas import tpu as pltpu


def _cross_attn_kernel(x_ref, m_ref, wq_ref, wk_ref, wv_ref, wo_ref, bo_ref,
                       o_ref, k_scr, v_scr, *, heads, dim_head, use_softmax):
    i = pl.program_id(1)

    # k/v depend only on the batch element, not on the query tile: compute
    # once per batch element and cache in VMEM scratch.
    @pl.when(i == 0)
    def _():
        mm = m_ref[0]                                                  # (Nm, Dp)
        k_scr[...] = jnp.dot(mm, wk_ref[...],
                             preferred_element_type=jnp.float32).astype(k_scr.dtype)
        v_scr[...] = jnp.dot(mm, wv_ref[...],
                             preferred_element_type=jnp.float32).astype(v_scr.dtype)

    x = x_ref[0]                                                       # (tn, Dp)
    # Full-width q projection (scale already folded into Wq host-side).
    q = jnp.dot(x, wq_ref[...], preferred_element_type=jnp.float32)    # (tn, inner)
    q = q.astype(x.dtype)                                              # MXU operand dtype

    k = k_scr[...]                                                     # (Nm, inner)
    v = v_scr[...]

    # Per-head attention: heads is a static Python int => unrolled at trace time.
    outs = []
    for h in range(heads):
        sl = slice(h * dim_head, (h + 1) * dim_head)
        q_h, k_h, v_h = q[:, sl], k[:, sl], v[:, sl]
        # Contract the dh axes directly (avoids materializing k^T).
        s = jax.lax.dot_general(q_h, k_h, (((1,), (1,)), ((), ())),
                                preferred_element_type=jnp.float32)    # (tn, Nm)
        if use_softmax:
            s = s - jnp.max(s, axis=-1, keepdims=True)
            e = jnp.exp(s)
            p = e * pl.reciprocal(jnp.sum(e, axis=-1, keepdims=True), approx=True)
        else:
            p = s
        outs.append(jnp.dot(p.astype(v_h.dtype), v_h,
                            preferred_element_type=jnp.float32))       # (tn, dh)

    out_cat = jnp.concatenate(outs, axis=-1)                           # (tn, inner)
    # Single full-inner output projection + bias (dropout p=0 => identity).
    y = jnp.dot(out_cat.astype(wo_ref.dtype), wo_ref[...],
                preferred_element_type=jnp.float32) + bo_ref[...]
    o_ref[0] = y.astype(o_ref.dtype)


def cross_attention(x, m, wq, wk, wv, wo, bo, *, heads, dim_head, scale,
                    use_softmax=True, compute_dtype=None, block_n=None,
                    vmem_limit_bytes=None):
    """x: (B, N, D), m: (B, Nm, D).
    wq/wk/wv: (D, inner) [already transposed vs. torch Linear.weight],
    wo: (inner, D), bo: (D,).
    compute_dtype: dtype of MXU operands (e.g. jnp.bfloat16 on v6e/v7x);
    accumulation and softmax stay in f32.
    """
    B, N, D = x.shape
    Bm, Nm, Dm = m.shape
    inner = heads * dim_head
    assert Bm == B and Dm == D
    assert wq.shape == (D, inner) and wk.shape == (D, inner) and wv.shape == (D, inner)
    assert wo.shape == (inner, D) and bo.shape == (D,)

    out_dtype = x.dtype
    if compute_dtype is None:
        compute_dtype = x.dtype

    # Fold the attention scale into Wq (host-side, zero runtime cost).
    wq = (wq.astype(jnp.float32) * scale).astype(compute_dtype)
    wk = wk.astype(compute_dtype)
    wv = wv.astype(compute_dtype)
    wo = wo.astype(compute_dtype)
    bo = bo.astype(jnp.float32)
    x = x.astype(compute_dtype)
    m = m.astype(compute_dtype)

    # Lane-align the model dim (zero padding => results unchanged, sliced off
    # at the end). Makes x/m loads and output stores lane-dense.
    LANE = 128
    Dp = ((D + LANE - 1) // LANE) * LANE
    if Dp != D:
        pad = Dp - D
        x = jnp.pad(x, ((0, 0), (0, 0), (0, pad)))
        m = jnp.pad(m, ((0, 0), (0, 0), (0, pad)))
        wq = jnp.pad(wq, ((0, pad), (0, 0)))
        wk = jnp.pad(wk, ((0, pad), (0, 0)))
        wv = jnp.pad(wv, ((0, pad), (0, 0)))
        wo = jnp.pad(wo, ((0, 0), (0, pad)))
        bo = jnp.pad(bo, ((0, pad),))
    bo2 = bo.reshape(1, Dp)

    # Query-axis tiling (pipelining + VMEM control at large N; re-derive the
    # tile / set vmem_limit_bytes for v7x's 64 MiB VMEM).
    if block_n is None:
        block_n = 512
    block_n = min(block_n, N)
    if block_n < N:
        block_n = max(8, (block_n // 8) * 8)   # sublane-aligned tiles
    Np = ((N + block_n - 1) // block_n) * block_n
    if Np != N:
        x = jnp.pad(x, ((0, 0), (0, Np - N), (0, 0)))
    n_tiles = Np // block_n

    kernel = functools.partial(_cross_attn_kernel, heads=heads,
                               dim_head=dim_head, use_softmax=use_softmax)

    cp = dict(dimension_semantics=("parallel", "arbitrary"))
    if vmem_limit_bytes is not None:
        cp["vmem_limit_bytes"] = vmem_limit_bytes

    out = pl.pallas_call(
        kernel,
        out_shape=jax.ShapeDtypeStruct((B, Np, Dp), out_dtype),
        grid_spec=pltpu.PrefetchScalarGridSpec(
            num_scalar_prefetch=0,
            grid=(B, n_tiles),
            in_specs=[
                pl.BlockSpec((1, block_n, Dp), lambda b, i: (b, i, 0)),  # x tile
                pl.BlockSpec((1, Nm, Dp), lambda b, i: (b, 0, 0)),       # m (const over i)
                pl.BlockSpec((Dp, inner), lambda b, i: (0, 0)),          # Wq (scaled)
                pl.BlockSpec((Dp, inner), lambda b, i: (0, 0)),          # Wk
                pl.BlockSpec((Dp, inner), lambda b, i: (0, 0)),          # Wv
                pl.BlockSpec((inner, Dp), lambda b, i: (0, 0)),          # Wo
                pl.BlockSpec((1, Dp), lambda b, i: (0, 0)),              # bias
            ],
            out_specs=pl.BlockSpec((1, block_n, Dp), lambda b, i: (b, i, 0)),
            scratch_shapes=[pltpu.VMEM((Nm, inner), compute_dtype),      # k cache
                            pltpu.VMEM((Nm, inner), compute_dtype)],     # v cache
        ),
        compiler_params=pltpu.CompilerParams(**cp),
    )(x, m, wq, wk, wv, wo, bo2)

    return out[:, :N, :D]


def cross_attention_ref(x, m, wq, wk, wv, wo, bo, *, heads, dim_head, scale,
                        use_softmax=True):
    """Pure-JAX reference (mirrors the PyTorch forward with mask=None)."""
    B, N, D = x.shape
    q = x @ wq
    k = m @ wk
    v = m @ wv

    def split(t):
        b, n, _ = t.shape
        return t.reshape(b, n, heads, dim_head).transpose(0, 2, 1, 3)

    q, k, v = split(q), split(k), split(v)
    dots = jnp.einsum('bhid,bhjd->bhij', q, k) * scale
    attn = jax.nn.softmax(dots, axis=-1) if use_softmax else dots
    out = jnp.einsum('bhij,bhjd->bhid', attn, v)
    out = out.transpose(0, 2, 1, 3).reshape(B, N, heads * dim_head)
    return out @ wo + bo


if __name__ == "__main__":
    # Small shapes consistent with the module's forward.
    B, N, Nm = 2, 8, 8
    dim, heads, dim_head = 32, 2, 16
    inner = heads * dim_head
    scale = dim ** (-0.5)   # matches the module: self.scale = dim ** (-0.5)

    key = jax.random.PRNGKey(0)
    kx, km, k1, k2, k3, k4, k5 = jax.random.split(key, 7)

    x = jax.random.normal(kx, (B, N, dim), dtype=jnp.float32)
    m = jax.random.normal(km, (B, Nm, dim), dtype=jnp.float32)

    # Parameters (shapes follow nn.Linear; stored transposed so y = x @ W).
    wq = jax.random.normal(k1, (dim, inner), dtype=jnp.float32) * 0.05
    wk = jax.random.normal(k2, (dim, inner), dtype=jnp.float32) * 0.05
    wv = jax.random.normal(k3, (dim, inner), dtype=jnp.float32) * 0.05
    wo = jax.random.normal(k4, (inner, dim), dtype=jnp.float32) * 0.05
    bo = jax.random.normal(k5, (dim,), dtype=jnp.float32) * 0.05

    ref = cross_attention_ref(x, m, wq, wk, wv, wo, bo,
                              heads=heads, dim_head=dim_head, scale=scale)

    # f32 operand path.
    out = cross_attention(x, m, wq, wk, wv, wo, bo,
                          heads=heads, dim_head=dim_head, scale=scale)
    out = jax.block_until_ready(out)
    assert out.shape == (B, N, dim)
    assert jnp.allclose(out, ref, atol=2e-3, rtol=2e-3), "f32 mismatch vs reference"

    # bf16 MXU-operand / f32-accumulate path (v6e / v7x peak).
    out_bf16 = cross_attention(x, m, wq, wk, wv, wo, bo,
                               heads=heads, dim_head=dim_head, scale=scale,
                               compute_dtype=jnp.bfloat16)
    out_bf16 = jax.block_until_ready(out_bf16)
    assert jnp.allclose(out_bf16.astype(jnp.float32), ref,
                        atol=5e-2, rtol=5e-2), "bf16 mismatch vs reference"

    # softmax=False branch of the module.
    out_ns = cross_attention(x, m, wq, wk, wv, wo, bo,
                             heads=heads, dim_head=dim_head, scale=scale,
                             use_softmax=False)
    ref_ns = cross_attention_ref(x, m, wq, wk, wv, wo, bo,
                                 heads=heads, dim_head=dim_head, scale=scale,
                                 use_softmax=False)
    out_ns = jax.block_until_ready(out_ns)
    assert jnp.allclose(out_ns, ref_ns, atol=2e-3, rtol=2e-3), "no-softmax mismatch"

    print("KERNEL_OK")
</pallas_src>

<mosaic_0001>
module attributes {stable_mosaic.version = 11 : i64} {
  func.func @_cross_attn_kernel(%arg0: i32, %arg1: i32, %arg2: memref<1x8x128xf32, #tpu.memory_space<vmem>>, %arg3: memref<1x8x128xf32, #tpu.memory_space<vmem>>, %arg4: memref<128x32xf32, #tpu.memory_space<vmem>>, %arg5: memref<128x32xf32, #tpu.memory_space<vmem>>, %arg6: memref<128x32xf32, #tpu.memory_space<vmem>>, %arg7: memref<32x128xf32, #tpu.memory_space<vmem>>, %arg8: memref<1x128xf32, #tpu.memory_space<vmem>>, %arg9: memref<1x8x128xf32, #tpu.memory_space<vmem>>, %arg10: memref<8x32xf32, #tpu.memory_space<vmem>>, %arg11: memref<8x32xf32, #tpu.memory_space<vmem>>) attributes {dimension_semantics = [#tpu.dimension_semantics<parallel>, #tpu.dimension_semantics<arbitrary>], iteration_bounds = array<i64: 2, 1>, scalar_prefetch = 0 : i64, scratch_operands = 2 : i64, tpu.core_type = #tpu.core_type<tc>, window_params = [{transform_indices = @transform_0, window_bounds = array<i64: 1, 8, 128>}, {transform_indices = @transform_1, window_bounds = array<i64: 1, 8, 128>}, {pipeline_mode = #tpu.pipeline_mode<synchronous>, transform_indices = @transform_2, window_bounds = array<i64: 128, 32>}, {pipeline_mode = #tpu.pipeline_mode<synchronous>, transform_indices = @transform_3, window_bounds = array<i64: 128, 32>}, {pipeline_mode = #tpu.pipeline_mode<synchronous>, transform_indices = @transform_4, window_bounds = array<i64: 128, 32>}, {pipeline_mode = #tpu.pipeline_mode<synchronous>, transform_indices = @transform_5, window_bounds = array<i64: 32, 128>}, {pipeline_mode = #tpu.pipeline_mode<synchronous>, transform_indices = @transform_6, window_bounds = array<i64: 1, 128>}, {transform_indices = @transform_7, window_bounds = array<i64: 1, 8, 128>}]} {
    %c0_i32 = arith.constant 0 : i32
    %0 = arith.cmpi eq, %arg1, %c0_i32 : i32
    %1 = arith.extui %0 : i1 to i32
    %c0_i32_0 = arith.constant 0 : i32
    %2 = arith.cmpi ne, %1, %c0_i32_0 : i32
    scf.if %2 {
      %c0_25 = arith.constant 0 : index
      %c0_26 = arith.constant 0 : index
      %c0_27 = arith.constant 0 : index
      %48 = vector.load %arg3[%c0_25, %c0_26, %c0_27] : memref<1x8x128xf32, #tpu.memory_space<vmem>>, vector<1x8x128xf32>
      %49 = vector.shape_cast %48 : vector<1x8x128xf32> to vector<8x128xf32>
      %c0_28 = arith.constant 0 : index
      %c0_29 = arith.constant 0 : index
      %50 = vector.load %arg5[%c0_28, %c0_29] : memref<128x32xf32, #tpu.memory_space<vmem>>, vector<128x32xf32>
      %cst_30 = arith.constant dense<0.000000e+00> : vector<8x32xf32>
      %51 = tpu.matmul %49, %50, %cst_30 {dimension_numbers = #tpu.dot_dimension_numbers<[1], [0], [0], [1], [0, 0, 1, 1], [], []>} : vector<8x128xf32>, vector<128x32xf32>, vector<8x32xf32> -> vector<8x32xf32>
      %c0_31 = arith.constant 0 : index
      %c0_32 = arith.constant 0 : index
      %52 = vector.load %arg10[%c0_31, %c0_32] : memref<8x32xf32, #tpu.memory_space<vmem>>, vector<8x32xf32>
      tpu.vector_store %arg10[%c0_31, %c0_32], %51 {strides = array<i32>} : memref<8x32xf32, #tpu.memory_space<vmem>>, vector<8x32xf32>,
      %c0_33 = arith.constant 0 : index
      %c0_34 = arith.constant 0 : index
      %53 = vector.load %arg6[%c0_33, %c0_34] : memref<128x32xf32, #tpu.memory_space<vmem>>, vector<128x32xf32>
      %cst_35 = arith.constant dense<0.000000e+00> : vector<8x32xf32>
      %54 = tpu.matmul %49, %53, %cst_35 {dimension_numbers = #tpu.dot_dimension_numbers<[1], [0], [0], [1], [0, 0, 1, 1], [], []>} : vector<8x128xf32>, vector<128x32xf32>, vector<8x32xf32> -> vector<8x32xf32>
      %c0_36 = arith.constant 0 : index
      %c0_37 = arith.constant 0 : index
      %55 = vector.load %arg11[%c0_36, %c0_37] : memref<8x32xf32, #tpu.memory_space<vmem>>, vector<8x32xf32>
      tpu.vector_store %arg11[%c0_36, %c0_37], %54 {strides = array<i32>} : memref<8x32xf32, #tpu.memory_space<vmem>>, vector<8x32xf32>,
    } else {
    }
    %c0 = arith.constant 0 : index
    %c0_1 = arith.constant 0 : index
    %c0_2 = arith.constant 0 : index
    %3 = vector.load %arg2[%c0, %c0_1, %c0_2] : memref<1x8x128xf32, #tpu.memory_space<vmem>>, vector<1x8x128xf32>
    %4 = vector.shape_cast %3 : vector<1x8x128xf32> to vector<8x128xf32>
    %c0_3 = arith.constant 0 : index
    %c0_4 = arith.constant 0 : index
    %5 = vector.load %arg4[%c0_3, %c0_4] : memref<128x32xf32, #tpu.memory_space<vmem>>, vector<128x32xf32>
    %cst = arith.constant dense<0.000000e+00> : vector<8x32xf32>
    %6 = tpu.matmul %4, %5, %cst {dimension_numbers = #tpu.dot_dimension_numbers<[1], [0], [0], [1], [0, 0, 1, 1], [], []>} : vector<8x128xf32>, vector<128x32xf32>, vector<8x32xf32> -> vector<8x32xf32>
    %c0_5 = arith.constant 0 : index
    %c0_6 = arith.constant 0 : index
    %7 = vector.load %arg10[%c0_5, %c0_6] : memref<8x32xf32, #tpu.memory_space<vmem>>, vector<8x32xf32>
    %c0_7 = arith.constant 0 : index
    %c0_8 = arith.constant 0 : index
    %8 = vector.load %arg11[%c0_7, %c0_8] : memref<8x32xf32, #tpu.memory_space<vmem>>, vector<8x32xf32>
    %9 = vector.extract_strided_slice %6 {offsets = [0, 0], sizes = [8, 16], strides = [1, 1]} : vector<8x32xf32> to vector<8x16xf32>
    %10 = vector.extract_strided_slice %7 {offsets = [0, 0], sizes = [8, 16], strides = [1, 1]} : vector<8x32xf32> to vector<8x16xf32>
    %11 = vector.extract_strided_slice %8 {offsets = [0, 0], sizes = [8, 16], strides = [1, 1]} : vector<8x32xf32> to vector<8x16xf32>
    %cst_9 = arith.constant dense<0.000000e+00> : vector<8x8xf32>
    %12 = tpu.matmul %9, %10, %cst_9 {dimension_numbers = #tpu.dot_dimension_numbers<[1], [1], [0], [0], [0, 0, 1, 0], [], []>} : vector<8x16xf32>, vector<8x16xf32>, vector<8x8xf32> -> vector<8x8xf32>
    %cst_10 = arith.constant dense<0xFF800000> : vector<8xf32>
    %13 = vector.multi_reduction <maximumf>, %12, %cst_10 [1] : vector<8x8xf32> to vector<8xf32>
    %14 = vector.shape_cast %13 : vector<8xf32> to vector<8x1xf32>
    %15 = vector.broadcast %14 : vector<8x1xf32> to vector<8x8xf32>
    %16 = arith.subf %12, %15 : vector<8x8xf32>
    %17 = math.exp %16 : vector<8x8xf32>
    %cst_11 = arith.constant dense<0.000000e+00> : vector<8xf32>
    %18 = vector.multi_reduction <add>, %17, %cst_11 [1] : vector<8x8xf32> to vector<8xf32>
    %19 = vector.shape_cast %18 : vector<8xf32> to vector<8x1xf32>
    %20 = tpu.reciprocal %19 {approx = true} : vector<8x1xf32> -> vector<8x1xf32>
    %21 = vector.broadcast %20 : vector<8x1xf32> to vector<8x8xf32>
    %22 = arith.mulf %17, %21 : vector<8x8xf32>
    %cst_12 = arith.constant dense<0.000000e+00> : vector<8x16xf32>
    %23 = tpu.matmul %22, %11, %cst_12 {dimension_numbers = #tpu.dot_dimension_numbers<[1], [0], [0], [1], [0, 0, 1, 1], [], []>} : vector<8x8xf32>, vector<8x16xf32>, vector<8x16xf32> -> vector<8x16xf32>
    %24 = vector.extract_strided_slice %6 {offsets = [0, 16], sizes = [8, 16], strides = [1, 1]} : vector<8x32xf32> to vector<8x16xf32>
    %25 = vector.extract_strided_slice %7 {offsets = [0, 16], sizes = [8, 16], strides = [1, 1]} : vector<8x32xf32> to vector<8x16xf32>
    %26 = vector.extract_strided_slice %8 {offsets = [0, 16], sizes = [8, 16], strides = [1, 1]} : vector<8x32xf32> to vector<8x16xf32>
    %cst_13 = arith.constant dense<0.000000e+00> : vector<8x8xf32>
    %27 = tpu.matmul %24, %25, %cst_13 {dimension_numbers = #tpu.dot_dimension_numbers<[1], [1], [0], [0], [0, 0, 1, 0], [], []>} : vector<8x16xf32>, vector<8x16xf32>, vector<8x8xf32> -> vector<8x8xf32>
    %cst_14 = arith.constant dense<0xFF800000> : vector<8xf32>
    %28 = vector.multi_reduction <maximumf>, %27, %cst_14 [1] : vector<8x8xf32> to vector<8xf32>
    %29 = vector.shape_cast %28 : vector<8xf32> to vector<8x1xf32>
    %30 = vector.broadcast %29 : vector<8x1xf32> to vector<8x8xf32>
    %31 = arith.subf %27, %30 : vector<8x8xf32>
    %32 = math.exp %31 : vector<8x8xf32>
    %cst_15 = arith.constant dense<0.000000e+00> : vector<8xf32>
    %33 = vector.multi_reduction <add>, %32, %cst_15 [1] : vector<8x8xf32> to vector<8xf32>
    %34 = vector.shape_cast %33 : vector<8xf32> to vector<8x1xf32>
    %35 = tpu.reciprocal %34 {approx = true} : vector<8x1xf32> -> vector<8x1xf32>
    %36 = vector.broadcast %35 : vector<8x1xf32> to vector<8x8xf32>
    %37 = arith.mulf %32, %36 : vector<8x8xf32>
    %cst_16 = arith.constant dense<0.000000e+00> : vector<8x16xf32>
    %38 = tpu.matmul %37, %26, %cst_16 {dimension_numbers = #tpu.dot_dimension_numbers<[1], [0], [0], [1], [0, 0, 1, 1], [], []>} : vector<8x8xf32>, vector<8x16xf32>, vector<8x16xf32> -> vector<8x16xf32>
    %39 = tpu.concatenate %23, %38 in 1 : vector<8x16xf32>, vector<8x16xf32> -> vector<8x32xf32>
    %c0_17 = arith.constant 0 : index
    %c0_18 = arith.constant 0 : index
    %40 = vector.load %arg7[%c0_17, %c0_18] : memref<32x128xf32, #tpu.memory_space<vmem>>, vector<32x128xf32>
    %cst_19 = arith.constant dense<0.000000e+00> : vector<8x128xf32>
    %41 = tpu.matmul %39, %40, %cst_19 {dimension_numbers = #tpu.dot_dimension_numbers<[1], [0], [0], [1], [0, 0, 1, 1], [], []>} : vector<8x32xf32>, vector<32x128xf32>, vector<8x128xf32> -> vector<8x128xf32>
    %c0_20 = arith.constant 0 : index
    %c0_21 = arith.constant 0 : index
    %42 = vector.load %arg8[%c0_20, %c0_21] : memref<1x128xf32, #tpu.memory_space<vmem>>, vector<1x128xf32>
    %43 = vector.broadcast %42 : vector<1x128xf32> to vector<8x128xf32>
    %44 = arith.addf %41, %43 : vector<8x128xf32>
    %c0_22 = arith.constant 0 : index
    %c0_23 = arith.constant 0 : index
    %c0_24 = arith.constant 0 : index
    %45 = vector.load %arg9[%c0_22, %c0_23, %c0_24] : memref<1x8x128xf32, #tpu.memory_space<vmem>>, vector<1x8x128xf32>
    %46 = vector.shape_cast %45 : vector<1x8x128xf32> to vector<8x128xf32>
    %47 = vector.shape_cast %44 : vector<8x128xf32> to vector<1x8x128xf32>
    tpu.vector_store %arg9[%c0_22, %c0_23, %c0_24], %47 {strides = array<i32>} : memref<1x8x128xf32, #tpu.memory_space<vmem>>, vector<1x8x128xf32>,
    return
  }
  func.func @transform_0(%arg0: i32, %arg1: i32) -> (i32, i32, i32) {
    %c0_i32 = arith.constant 0 : i32
    %c0_i32_0 = arith.constant 0 : i32
    return %arg0, %arg1, %c0_i32 : i32, i32, i32
  }
  func.func @transform_1(%arg0: i32, %arg1: i32) -> (i32, i32, i32) {
    %c0_i32 = arith.constant 0 : i32
    %c0_i32_0 = arith.constant 0 : i32
    %c0_i32_1 = arith.constant 0 : i32
    return %arg0, %c0_i32, %c0_i32_0 : i32, i32, i32
  }
  func.func @transform_2(%arg0: i32, %arg1: i32) -> (i32, i32) {
    %c0_i32 = arith.constant 0 : i32
    %c0_i32_0 = arith.constant 0 : i32
    %c0_i32_1 = arith.constant 0 : i32
    return %c0_i32, %c0_i32_0 : i32, i32
  }
  func.func @transform_3(%arg0: i32, %arg1: i32) -> (i32, i32) {
    %c0_i32 = arith.constant 0 : i32
    %c0_i32_0 = arith.constant 0 : i32
    %c0_i32_1 = arith.constant 0 : i32
    return %c0_i32, %c0_i32_0 : i32, i32
  }
  func.func @transform_4(%arg0: i32, %arg1: i32) -> (i32, i32) {
    %c0_i32 = arith.constant 0 : i32
    %c0_i32_0 = arith.constant 0 : i32
    %c0_i32_1 = arith.constant 0 : i32
    return %c0_i32, %c0_i32_0 : i32, i32
  }
  func.func @transform_5(%arg0: i32, %arg1: i32) -> (i32, i32) {
    %c0_i32 = arith.constant 0 : i32
    %c0_i32_0 = arith.constant 0 : i32
    %c0_i32_1 = arith.constant 0 : i32
    return %c0_i32, %c0_i32_0 : i32, i32
  }
  func.func @transform_6(%arg0: i32, %arg1: i32) -> (i32, i32) {
    %c0_i32 = arith.constant 0 : i32
    %c0_i32_0 = arith.constant 0 : i32
    %c0_i32_1 = arith.constant 0 : i32
    return %c0_i32, %c0_i32_0 : i32, i32
  }
  func.func @transform_7(%arg0: i32, %arg1: i32) -> (i32, i32, i32) {
    %c0_i32 = arith.constant 0 : i32
    %c0_i32_0 = arith.constant 0 : i32
    return %arg0, %arg1, %c0_i32 : i32, i32, i32
  }
}

</mosaic_0001>

<bundles_post_ra>
// kernel: tpu_custom_call.1
= control target key start
LH: loop header
LB: loop body
LE: loop exit
PB: predicated region body
PF: predicated region fallthrough
CT: control target
= control target key end

     0   :  { %12 = vsyncpa [#allocation5], 0  ;;  %s1938_s0 = inlined_call_operand.vmem [shape: f32[2,8,128], index: 0, kind: input, shape index: {}]   ;;  %s1939_s1 = inlined_call_operand.vmem [shape: f32[2,8,128], index: 1, kind: input, shape index: {}]   ;;  %s1940_s2 = inlined_call_operand.vmem [shape: f32[128,32], index: 2, kind: input, shape index: {}]   ;;  %s1941_s3 = inlined_call_operand.vmem [shape: f32[128,32], index: 3, kind: input, shape index: {}]   ;;  %s1942_s4 = inlined_call_operand.vmem [shape: f32[128,32], index: 4, kind: input, shape index: {}]   ;;  %s1943_s5 = inlined_call_operand.vmem [shape: f32[32,128], index: 5, kind: input, shape index: {}]   ;;  %s1944_s6 = inlined_call_operand.vmem [shape: f32[1,128], index: 6, kind: input, shape index: {}]   ;;  %s1945_s7 = inlined_call_operand.hbm [shape: f32[2,8,128], index: 7, kind: output, shape index: {}]  }
   0x1   :  { %14 = vsyncpa [#allocation5 + $0x1], 0  ;;  %s1594_s24 = smov 0   ;;  %s1596_s25 = smov 0  }
   0x2   :  { %s1598_s26 = smov 0   ;;  %s1600_s27 = smov 0  }
   0x3   :  { %s1602_s28 = smov 0   ;;  %s1604_s29 = smov 0  }
   0x4 LB: > { %s1102_s30 = sadd.s32 4294967295, %s1546_s29   ;;  %s1103_s8 = sadd.s32 4294967294, %s1546_s29   ;;  %s1546_s29 = sphi %s1604_s29, %s20_s29   ;;  %s1542_s28 = sphi %s1602_s28, %s1952_s28   ;;  %s1538_s27 = sphi %s1600_s27, %s1951_s27   ;;  %s1534_s26 = sphi %s1598_s26, %s1950_s26   ;;  %s1530_s25 = sphi %s1596_s25, %s1949_s25   ;;  %s1526_s24 = sphi %s1594_s24, %s1948_s24  }
   0x5   : > { %s32_s9 = sadd.s32 1, %s1542_s28  ;;  %s200_s10 = sadd.s32 1, %s1534_s26 }
   0x6   : > { %p34_p0 = scmp.ge.s32.totalorder %s32_s9, 2  ;;  %p210_p1 = scmp.ne.s32.totalorder %s1534_s26, %s1530_s25 }
   0x7   : > { %p211_p2 = scmp.eq.s32.totalorder %s1102_s30, 1  ;;  %p216_p3 = scmp.ne.s32.totalorder %s1530_s25, %s1526_s24 }
   0x8   : > { %s1954_s9 = smov (%p34_p0, %s32_s9), 0  ;;  %p217_p5 = scmp.eq.s32.totalorder %s1103_s8, 1 }
   0x9   : > { %p1634_p4 = por %p211_p2, %p210_p1  ;;  %s195_s12 = ssub.s32 %s1542_s28, %s1954_s9 }
   0xa   : > { %p1106_p6 = scmp.ge.s32.totalorder %s1546_s29, 1  ;;  %p198_p7 = scmp.eq.s32.totalorder %s195_s12, 0 }
   0xb   : > { %p1641_p8 = por %p217_p5, %p216_p3  ;;  %p267_p9 = scmp.lt.s32.totalorder %s1546_s29, 3 }
   0xc   : > { %s1647_s14 = scalar_select %p198_p7, %s1534_s26, %s200_s10  }
   0xd   : > { %p268_p10 = pnand %p1106_p6, %p267_p9 }
   0xe   : > { %v321_v0 = vld [vmem:[%s1941_s3] sm:$0xff] (!%p268_p10)  ;;  %v322_v1 = vld [vmem:[%s1941_s3 + $0x8] sm:$0xff] (!%p268_p10)  ;;  %v323_v2 = vld [vmem:[%s1941_s3 + $0x10] sm:$0xff] (!%p268_p10)  ;;  %v1548_v3 = vmov (!%p268_p10), 0.0|0.0   ;;  %vm1549_vm0 = vmmov (!%p268_p10), 0   ;;  %v1550_v6 = vmov (!%p268_p10), 0.0  }
   0xf   : > { %271 = sbr.rel (%p268_p10) target bundleno = 1904 (0x770), region = 48  ;;  %1322 = vmatprep.subr.bf16.mxu0 (!%p268_p10), %v1548_v3  ;;  %v1323_v4 = vpack.c.bf16 (!%p268_p10), %v322_v1, %v321_v0  ;;  %v324_v5 = vld [vmem:[%s1941_s3 + $0x18] sm:$0xff] (!%p268_p10)  ;;  %1218 = vmatprep.mubr.msk.f32.mxu0 (!%p268_p10), %vm1549_vm0, %v1550_v6  ;;  %v325_v8 = vld [vmem:[%s1941_s3 + $0x20] sm:$0xff] (!%p268_p10)  ;;  %v326_v9 = vld [vmem:[%s1941_s3 + $0x28] sm:$0xff] (!%p268_p10)  ;;  %p305_p11 = scmp.lt.s32.totalorder (!%p268_p10), %s1538_s27, 1  ;;  %vm407_vm1 = vcmask (!%p268_p10), 261120  }
  0x10   : > { %1346 = vmatprep.subr.bf16.mxu1 (!%p268_p10), %v1548_v3  ;;  %1253 = vmatprep.mubr.msk.f32.mxu1 (!%p268_p10), %vm1549_vm0, %v1550_v6  ;;  %v1326_v7 = vpack.c.bf16 (!%p268_p10), %v324_v5, %v323_v2  ;;  %v1329_v10 = vpack.c.bf16 (!%p268_p10), %v326_v9, %v325_v8  ;;  %v327_v11 = vld [vmem:[%s1941_s3 + $0x30] sm:$0xff] (!%p268_p10)  ;;  %v328_v12 = vld [vmem:[%s1941_s3 + $0x38] sm:$0xff] (!%p268_p10)  ;;  %v329_v14 = vld [vmem:[%s1941_s3 + $0x40] sm:$0xff] (!%p268_p10)  ;;  %vm585_vm2 = vcmask (!%p268_p10), 130048   ;;  %vm662_vm3 = vcmask (!%p268_p10), 64512   ;;  %s1552_s19 = smov (!%p268_p10), 16  }
  0x11   : > { %1324 = vmatpush3.bf16.msra.mxu0 (!%p268_p10), %v1323_v4  ;;  %v1332_v13 = vpack.c.bf16 (!%p268_p10), %v328_v12, %v327_v11  ;;  %v409_v15 = vld [vmem:[%s1942_s4] sm:$0xff] (!%p268_p10)  ;;  %v410_v16 = vld [vmem:[%s1942_s4 + $0x8] sm:$0xff] (!%p268_p10)  ;;  %v411_v19 = vld [vmem:[%s1942_s4 + $0x10] sm:$0xff] (!%p268_p10)  ;;  %s302_s21 = sand.u32 (!%p268_p10), 1, %s1530_s25  }
  0x12   : > { %1325 = vmatprep.subr.bf16.mxu0 (!%p268_p10), %v1548_v3  ;;  %v330_v17 = vld [vmem:[%s1941_s3 + $0x48] sm:$0xff] (!%p268_p10)  ;;  %v1347_v18 = vpack.c.bf16 (!%p268_p10), %v410_v16, %v409_v15  ;;  %v412_v20 = vld [vmem:[%s1942_s4 + $0x18] sm:$0xff] (!%p268_p10)  ;;  %v413_v23 = vld [vmem:[%s1942_s4 + $0x20] sm:$0xff] (!%p268_p10)  ;;  %s1107_s22 = sshll.u32 (!%p268_p10), %s302_s21, 3  ;;  %s1005_s17 = scalar_lea.sflag (!%p268_p10), [#allocation5], %s302_s21 }
  0x13   : > { %v1350_v21 = vpack.c.bf16 (!%p268_p10), %v412_v20, %v411_v19  ;;  %v1335_v22 = vpack.c.bf16 (!%p268_p10), %v330_v17, %v329_v14  ;;  %v414_v24 = vld [vmem:[%s1942_s4 + $0x28] sm:$0xff] (!%p268_p10)  ;;  %v331_v25 = vld [vmem:[%s1941_s3 + $0x50] sm:$0xff] (!%p268_p10)  ;;  %v332_v26 = vld [vmem:[%s1941_s3 + $0x58] sm:$0xff] (!%p268_p10)  ;;  %s304_s8 = scalar_lea.vmem (!%p268_p10), [#allocation4], %s1107_s22 }
  0x14   : > { %1348 = vmatpush3.bf16.msra.mxu1 (!%p268_p10), %v1347_v18  ;;  %v1353_v27 = vpack.c.bf16 (!%p268_p10), %v414_v24, %v413_v23  ;;  %v1338_v28 = vpack.c.bf16 (!%p268_p10), %v332_v26, %v331_v25  ;;  %v415_v29 = vld [vmem:[%s1942_s4 + $0x30] sm:$0xff] (!%p268_p10)  ;;  %v416_v30 = vld [vmem:[%s1942_s4 + $0x38] sm:$0xff] (!%p268_p10)  ;;  %v333_v31 = vld [vmem:[%s1941_s3 + $0x60] sm:$0xff] (!%p268_p10)  ;;  %s1019_s10 = sshll.u32 (!%p268_p10), %s304_s8, 4  ;;  %s1893_s10 = int_to_ptr.vmem [resolvable:$true] %s1019_s10 }
  0x15   : > { %1327 = vmatpush3.bf16.msra.mxu0 (!%p268_p10), %v1326_v7  ;;  %1349 = vmatprep.subr.bf16.mxu1 (!%p268_p10), %v1548_v3  ;;  %v334_v32 = vld [vmem:[%s1941_s3 + $0x68] sm:$0xff] (!%p268_p10)  ;;  %v1356_v33 = vpack.c.bf16 (!%p268_p10), %v416_v30, %v415_v29  ;;  %v417_v35 = vld [vmem:[%s1942_s4 + $0x40] sm:$0xff] (!%p268_p10)  ;;  %v335_v37 = vld [vmem:[%s1941_s3 + $0x70] sm:$0xff] (!%p268_p10) }
  0x16   : > { %1328 = vmatprep.subr.bf16.mxu0 %v1548_v3  ;;  %s1730_s20 = scalar_select %p305_p11, %s1538_s27, 1  ;;  %v1341_v34 = vpack.c.bf16 %v334_v32, %v333_v31  ;;  %v418_v36 = vld [vmem:[%s1942_s4 + $0x48] sm:$0xff]  ;;  %v336_v38 = vld [vmem:[%s1941_s3 + $0x78] sm:$0xff]  ;;  %v419_v41 = vld [vmem:[%s1942_s4 + $0x50] sm:$0xff] }
  0x17   : > { %v1359_v39 = vpack.c.bf16 %v418_v36, %v417_v35  ;;  %v1344_v40 = vpack.c.bf16 %v336_v38, %v335_v37  ;;  %v420_v42 = vld [vmem:[%s1942_s4 + $0x58] sm:$0xff]  ;;  %v497_v43 = vld [vmem:[%s1940_s2] sm:$0xff]  ;;  %v498_v44 = vld [vmem:[%s1940_s2 + $0x8] sm:$0xff] }
  0x18   : > { %1351 = vmatpush3.bf16.msra.mxu1 %v1350_v21  ;;  %s1108_s16 = sshll.u32 %s1730_s20, 3  ;;  %v1362_v45 = vpack.c.bf16 %v420_v42, %v419_v41  ;;  %v1371_v47 = vpack.c.bf16 %v498_v44, %v497_v43  ;;  %v421_v48 = vld [vmem:[%s1942_s4 + $0x60] sm:$0xff]  ;;  %v422_v49 = vld [vmem:[%s1942_s4 + $0x68] sm:$0xff]  ;;  %v499_v50 = vld [vmem:[%s1940_s2 + $0x10] sm:$0xff]  ;;  %s1551_s20 = smov 112  }
  0x19   : > { %1330 = vmatpush3.bf16.msra.mxu0 %v1329_v10  ;;  %1352 = vmatprep.subr.bf16.mxu1 %v1548_v3  ;;  %s315_s30 = scalar_lea.vmem %s1939_s1, %s1108_s16  ;;  %v500_v51 = vld [vmem:[%s1940_s2 + $0x18] sm:$0xff]  ;;  %v1365_v52 = vpack.c.bf16 %v422_v49, %v421_v48  ;;  %v501_v54 = vld [vmem:[%s1940_s2 + $0x20] sm:$0xff]  ;;  %v502_v55 = vld [vmem:[%s1940_s2 + $0x28] sm:$0xff]  ;;  %s311_s18 = scalar_lea.vmem %s1938_s0, %s1108_s16 }
  0x1a   : > { %1331 = vmatprep.subr.bf16.mxu0 %v1548_v3  ;;  %v320_v46 = vld [vmem:[%s315_s30] sm:$0xff]  ;;  %v1374_v53 = vpack.c.bf16 %v500_v51, %v499_v50  ;;  %v1377_v56 = vpack.c.bf16 %v502_v55, %v501_v54  ;;  %v503_v57 = vld [vmem:[%s1940_s2 + $0x30] sm:$0xff]  ;;  %v504_v58 = vld [vmem:[%s1940_s2 + $0x38] sm:$0xff]  ;;  %s1119_s16 = sshll.u32 %s1538_s27, 7  ;;  %s1553_s27 = smov [#allocation4]  }
  0x1b   : > { %v1380_v59 = vpack.c.bf16 %v504_v58, %v503_v57  ;;  %v505_v60 = vld [vmem:[%s1940_s2 + $0x40] sm:$0xff]  ;;  %v506_v61 = vld [vmem:[%s1940_s2 + $0x48] sm:$0xff]  ;;  %v507_v63 = vld [vmem:[%s1940_s2 + $0x50] sm:$0xff]  ;;  %s1891_s15 = scalar_lea.hbm %s1945_s7, %s1119_s16 }
  0x1c   : > { %1354 = vmatpush3.bf16.msra.mxu1 %v1353_v27  ;;  %v1383_v62 = vpack.c.bf16 %v506_v61, %v505_v60  ;;  %v508_v0 = vld [vmem:[%s1940_s2 + $0x58] sm:$0xff]  ;;  %v509_v2 = vld [vmem:[%s1940_s2 + $0x60] sm:$0xff]  ;;  %v510_v4 = vld [vmem:[%s1940_s2 + $0x68] sm:$0xff] }
  0x1d   : > { %1333 = vmatpush3.bf16.msra.mxu0 %v1332_v13  ;;  %1355 = vmatprep.subr.bf16.mxu1 %v1548_v3  ;;  %v1386_v1 = vpack.c.bf16 %v508_v0, %v507_v63  ;;  %v1389_v5 = vpack.c.bf16 %v510_v4, %v509_v2  ;;  %v511_v7 = vld [vmem:[%s1940_s2 + $0x70] sm:$0xff]  ;;  %v512_v8 = vld [vmem:[%s1940_s2 + $0x78] sm:$0xff]  ;;  %v496_v10 = vld [vmem:[%s311_s18] sm:$0xff]  ;;  %s1468_s18 = scalar_lea.vmem %s1893_s10, 128 }
  0x1e   : > { %1334 = vmatprep.subr.bf16.mxu0 %v1548_v3  ;;  %v1392_v9 = vpack.c.bf16 %v512_v8, %v511_v7  ;;  %v423_v11 = vld [vmem:[%s1942_s4 + $0x70] sm:$0xff]  ;;  %v424_v12 = vld [vmem:[%s1942_s4 + $0x78] sm:$0xff]  ;;  %v918_v49 = vld [vmem:[%s1943_s5] sm:$0xff]  ;;  %p1469_p12 = scmp.ne.s32.totalorder %s1893_s10, %s1468_s18 }
  0x1f   : > { %v1368_v13 = vpack.c.bf16 %v424_v12, %v423_v11  ;;  %v919_v50 = vld [vmem:[%s1943_s5 + $0x8] sm:$0xff]  ;;  %v920_v51 = vld [vmem:[%s1943_s5 + $0x10] sm:$0xff]  ;;  %v1116_v58 = vld [vmem:[%s1944_s6] ss:$0 sm:$0xff] }
  0x20   : > { %1357 = vmatpush3.bf16.msra.mxu1 %v1356_v33  ;;  %p1470_p13 = pnand %p1469_p12, %p1634_p4 }
  0x21   : > { %1336 = vmatpush3.bf16.msra.mxu0 %v1335_v22  ;;  %1358 = vmatprep.subr.bf16.mxu1 %v1548_v3 }
  0x22   : > { %1337 = vmatprep.subr.bf16.mxu0 %v1548_v3  ;;  %p1471_p0 = pneg %p1470_p13 }
  0x24   : > { %1360 = vmatpush3.bf16.msra.mxu1 %v1359_v39 }
  0x25   : > { %1339 = vmatpush3.bf16.msra.mxu0 %v1338_v28  ;;  %1361 = vmatprep.subr.bf16.mxu1 %v1548_v3 }
  0x26   : > { %1340 = vmatprep.subr.bf16.mxu0 %v1548_v3 }
  0x28   : > { %1363 = vmatpush3.bf16.msra.mxu1 %v1362_v45 }
  0x29   : > { %1342 = vmatpush3.bf16.msra.mxu0 %v1341_v34  ;;  %1364 = vmatprep.subr.bf16.mxu1 %v1548_v3 }
  0x2a   : > { %1343 = vmatprep.subr.bf16.mxu0 %v1548_v3 }
  0x2c   : > { %1366 = vmatpush3.bf16.msra.mxu1 %v1365_v52  ;;  %v1395_v52 = vpack.c.bf16 %v919_v50, %v918_v49 }
  0x2d   : > { %1345 = vmatpush3.bf16.msra.mxu0 %v1344_v40  ;;  %1367 = vmatprep.subr.bf16.mxu1 %v1548_v3 }
  0x2e   : > { %1370 = vmatprep.subr.bf16.mxu0 %v1548_v3 }
  0x30   : > { %1219 = vmatmul.mubr.f32.vlgmr.msra.gmra.mrb[0].mxu0 %v320_v46  ;;  %1369 = vmatpush3.bf16.msra.mxu1 %v1368_v13 }
  0x31   : > { %1372 = vmatpush3.bf16.msra.mxu0 %v1371_v47  ;;  %1288 = vmatprep.mubr.msk.f32.mxu0 %vm1549_vm0, %v1550_v6 }
  0x32   : > { %1373 = vmatprep.subr.bf16.mxu0 %v1548_v3  ;;  %1291 = vmatprep.subr.mxu1 %v1550_v6 }
  0x33   : > { %1254 = vmatmul.mubr.f32.vlgmr.msra.gmra.mrb[0].mxu1 %v320_v46 }
  0x34   : > { %1293 = vmatprep.mubr.msk.f32.mxu1 %vm1549_vm0, %v1550_v6 }
  0x35   : > { %1375 = vmatpush3.bf16.msra.mxu0 %v1374_v53  ;;  %v921_v53 = vld [vmem:[%s1943_s5 + $0x18] sm:$0xff] }
  0x36   : > { %1376 = vmatprep.subr.bf16.mxu0 %v1548_v3 }
  0x39   : > { %1378 = vmatpush3.bf16.msra.mxu0 %v1377_v56 }
  0x3a   : > { %1379 = vmatprep.subr.bf16.mxu0 %v1548_v3 }
  0x3d   : > { %1381 = vmatpush3.bf16.msra.mxu0 %v1380_v59 }
  0x3e   : > { %1382 = vmatprep.subr.bf16.mxu0 %v1548_v3 }
  0x41   : > { %1384 = vmatpush3.bf16.msra.mxu0 %v1383_v62 }
  0x42   : > { %1385 = vmatprep.subr.bf16.mxu0 %v1548_v3 }
  0x45   : > { %1387 = vmatpush3.bf16.msra.mxu0 %v1386_v1 }
  0x46   : > { %1388 = vmatprep.subr.bf16.mxu0 %v1548_v3 }
  0x49   : > { %1390 = vmatpush3.bf16.msra.mxu0 %v1389_v5 }
  0x4a   : > { %1391 = vmatprep.subr.bf16.mxu0 %v1548_v3 }
  0x4d   : > { %1393 = vmatpush3.bf16.msra.mxu0 %v1392_v9 }
  0x50   : > { %1289 = vmatmul.mubr.f32.vlgmr.msra.gmra.mrb[2].mxu0 %v496_v10 }
 0x103   : > { %v403_v14 = vpop.f32.mrb[0].mxu0 }
 0x104   : > { %408 = vst.msk [vmem:[#allocation2] sm:$0xff] %vm407_vm1, %v403_v14  ;;  %v1220_v15 = vpop.f32.mrb[1].mxu0 }
 0x106   : > { %v491_v19 = vpop.f32.mrb[0].mxu1 }
 0x107   : > { %495 = vst.msk [vmem:[#allocation3] sm:$0xff] %vm407_vm1, %v491_v19  ;;  %v1255_v20 = vpop.f32.mrb[1].mxu1 }
 0x10b   : > { %v583_v16 = vld [vmem:[#allocation2] sm:$0xff] }
 0x10c   : > { %749 = vrot.lane.b32.xlu1 %v583_v16, %s1551_s20  ;;  %1292 = vmatpush3.xpose.msk.msra.mxu1 %vm585_vm2, %v583_v16 }
 0x10d   : > { %1296 = vmatprep.subr.mxu1 %v1550_v6 }
 0x10e   : > { %v584_v21 = vld [vmem:[#allocation3] sm:$0xff] }
 0x123   : > { %v579_v17 = vpop.f32.mrb[2].mxu0 }
 0x124   : > { %747 = vrot.lane.b32.xlu1 %v579_v17, %s1551_s20  ;;  %v1290_v18 = vpop.f32.mrb[3].mxu0  ;;  %1294 = vmatmul.mubr.msk.f32.vlgmr.msra.gmra.mrb[2].mxu1 %vm585_vm2, %v579_v17 }
 0x125   : > { %1298 = vmatprep.mubr.msk.f32.mxu1 %vm1549_vm0, %v1550_v6  ;;  %1297 = vmatpush3.msra.mxu1 %v584_v21 }
 0x126   : > { %1301 = vmatprep.subr.mxu1 %v1550_v6 }
 0x17e   : > { %v750_v33 = vpop.permute.xlu1 %749 }
 0x196   : > { %v748_v34 = vpop.permute.xlu1 %747 }
 0x1f7   : > { %v658_v22 = vpop.f32.mrb[2].mxu1 }
 0x1f8   : > { %v1295_v23 = vpop.f32.mrb[3].mxu1  ;;  %v663_v24 = vsel %vm662_vm3, %v658_v22, -inf }
 0x1f9   : > { %664 = vmax.xlane.f32.xlu0 %v663_v24 }
 0x286   : > { %v665_v25 = vpop.xlane.xlu0 %664 }
 0x287   : > { %v666_v26 = vsub.f32 %v658_v22, %v665_v25 }
 0x289   : > { %v667_v27 = vmul.f32 1.442695, %v666_v26 }
 0x28b   : > { %1460 = vpow2.f32 %v667_v27 }
 0x295   : > { %v1461_v28 = vpop.eup %1460 }
 0x296   : > { %v669_v29 = vsel %vm662_vm3, %v1461_v28, 0.0 }
 0x297   : > { %670 = vadd.xlane.f32.xlu0 %v669_v29 }
 0x324   : > { %v671_v30 = vpop.xlane.xlu0 %670 }
 0x325   : > { %1462 = vrcp.f32 %v671_v30 }
 0x32f   : > { %v1463_v31 = vpop.eup %1462 }
 0x330   : > { %v673_v32 = vmul.f32 %v1463_v31, %v1461_v28 }
 0x332   : > { %1299 = vmatmul.mubr.msk.f32.vlgmr.msra.gmra.mrb[4].mxu1 %vm662_vm3, %v673_v32 }
 0x333   : > { %1302 = vmatpush3.xpose.msk.msra.mxu1 %vm585_vm2, %v750_v33  ;;  %1303 = vmatprep.mubr.msk.f32.mxu1 %vm1549_vm0, %v1550_v6 }
 0x334   : > { %1306 = vmatprep.subr.mxu1 %v1550_v6 }
 0x336   : > { %1304 = vmatmul.mubr.msk.f32.vlgmr.msra.gmra.mrb[6].mxu1 %vm585_vm2, %v748_v34 }
 0x337   : > { %1308 = vmatprep.mubr.msk.f32.mxu1 %vm1549_vm0, %v1550_v6 }
 0x405   : > { %v743_v35 = vpop.f32.mrb[4].mxu1 }
 0x406   : > { %v1300_v36 = vpop.f32.mrb[5].mxu1 }
 0x409   : > { %v821_v37 = vpop.f32.mrb[6].mxu1 }
 0x40a   : > { %v1305_v38 = vpop.f32.mrb[7].mxu1  ;;  %v825_v39 = vsel %vm662_vm3, %v821_v37, -inf }
 0x40b   : > { %826 = vmax.xlane.f32.xlu0 %v825_v39 }
 0x421   : > { %837 = vrot.lane.b32.xlu0 %v584_v21, %s1551_s20 }
 0x498   : > { %v827_v40 = vpop.xlane.xlu0 %826 }
 0x499   : > { %v828_v41 = vsub.f32 %v821_v37, %v827_v40 }
 0x49b   : > { %v829_v42 = vmul.f32 1.442695, %v828_v41 }
 0x49c   : > { %v838_v43 = vpop.permute.xlu0 %837 }
 0x49d   : > { %1464 = vpow2.f32 %v829_v42  ;;  %1307 = vmatpush3.msra.mxu1 %v838_v43 }
 0x49e   : > { %1394 = vmatprep.subr.bf16.mxu1 %v1548_v3 }
 0x4a7   : > { %v1465_v44 = vpop.eup %1464 }
 0x4a8   : > { %v831_v45 = vsel %vm662_vm3, %v1465_v44, 0.0 }
 0x4a9   : > { %832 = vadd.xlane.f32.xlu1 %v831_v45 }
 0x536   : > { %v833_v46 = vpop.xlane.xlu1 %832 }
 0x537   : > { %1466 = vrcp.f32 %v833_v46 }
 0x541   : > { %v1467_v47 = vpop.eup %1466 }
 0x542   : > { %v835_v48 = vmul.f32 %v1467_v47, %v1465_v44 }
 0x544   : > { %1309 = vmatmul.mubr.msk.f32.vlgmr.msra.gmra.mrb[8].mxu1 %vm662_vm3, %v835_v48 }
 0x545   : > { %1319 = vmatprep.mubr.msk.f32.mxu1 %vm1549_vm0, %v1550_v6  ;;  %1396 = vmatpush3.bf16.msra.mxu1 %v1395_v52  ;;  %v1398_v6 = vpack.c.bf16 %v921_v53, %v920_v51 }
 0x546   : > { %1397 = vmatprep.subr.bf16.mxu1 %v1548_v3 }
 0x549   : > { %1399 = vmatpush3.bf16.msra.mxu1 %v1398_v6 }
 0x617   : > { %v909_v54 = vpop.f32.mrb[8].mxu1 }
 0x618   : > { %914 = vrot.lane.b32.xlu0 %v909_v54, %s1552_s19  ;;  %v1310_v55 = vpop.f32.mrb[9].mxu1  ;;  %s1472_s19 = sshll.u32 %s1553_s27, 4  ;;  %s1473_s19 = int_to_ptr.vmem [resolvable:$false] %s1472_s19 }
 0x619   : > { %s1474_s22 = scalar_lea.vmem %s1473_s19, 256  ;;  %p1475_p1 = scmp.lt.s32.totalorder %s1893_s10, %s1473_s19 }
 0x61a   : > { %p1476_p2 = scmp.lt.s32.totalorder %s1474_s22, %s1468_s18 }
 0x61c   : > { %p1477_p3 = por %p1476_p2, %p1475_p1 }
 0x61e   : > { %p1478_p5 = pnand %p1477_p3, %p1471_p0 }
 0x68a   : > { %v915_v56 = vpop.permute.xlu0 %914 }
 0x68b   : > { %v917_v57 = vsel %vm585_vm2, %v743_v35, %v915_v56 }
 0x68c   : > { %1320 = vmatmul.mubr.msk.f32.vlgmr.msra.gmra.mrb[10].mxu1 %vm407_vm1, %v917_v57 }
 0x75f   : > { %v999_v3 = vpop.f32.mrb[10].mxu1 }
 0x760   : > { %v1000_v59 = vadd.f32 %v1116_v58, %v999_v3  ;;  %v1321_v60 = vpop.f32.mrb[11].mxu1 }
 0x762   : > { %1003 = vst [vmem:[%s304_s8] sm:$0xff] %v1000_v59 }
 0x763   : > { %1481 = shalt.err (!%p1478_p5)
}
 0x764   : > { %s1482_s21 = scalar_lea.hbm %s1891_s15, 128  ;;  %s1486_s16 = scalar_lea.hbm %s1945_s7, 256 }
 0x765   : > { %p1483_p6 = scmp.ne.s32.totalorder %s1891_s15, %s1482_s21  ;;  %p1487_p10 = scmp.lt.u32.totalorder %s1891_s15, %s1945_s7 }
 0x766   : > { %p1488_p11 = scmp.lt.u32.totalorder %s1486_s16, %s1482_s21  ;;  %p1490_p13 = scmp.lt.u32.totalorder %s1482_s21, %s1891_s15 }
 0x767   : > { %p1484_p7 = pnand %p1483_p6, %p1634_p4 }
 0x768   : > { %p1489_p12 = por %p1488_p11, %p1487_p10 }
 0x769   : > { %p1485_p9 = pneg %p1484_p7 }
 0x76a   : > { %p1491_p0 = por %p1490_p13, %p1489_p12 }
 0x76c   : > { %p1492_p1 = pnand %p1491_p0, %p1485_p9 }
 0x76e   : > { %1495 = shalt.err (!%p1492_p1)
}
 0x76f   : > { %1400 = dma.vmem_to_hbm [thread:$0]  (%p1634_p4), %s1893_s10, 128, %s1891_s15, %s1005_s17  }
 0x770 PF: > { %p1406_p2 = scmp.ge.s32.totalorder %s1546_s29, 2  ;;  %s1031_s12 = sand.u32 1, %s1526_s24  }
 0x771   : > { %s1032_s18 = scalar_lea.sflag [#allocation5], %s1031_s12 }
 0x772   : > { %p1403_p3 = pnand %p1406_p2, %p1641_p8 }
 0x774   : > { %1521 = dma.done.wait (!%p1403_p3), %s1032_s18, 128  }
 0x775   : > { %1523 = vsyncadd (!%p1403_p3), %s1032_s18, 4294967168  ;;  %s20_s29 = sadd.s32 1, %s1546_s29   ;;  %s1948_s24 = smov %s1530_s25 }
 0x776   : > { %p17_p5 = scmp.ge.s32.totalorder %s20_s29, 4   ;;  %s1949_s25 = smov %s1534_s26 }
 0x777   : > { %s1950_s26 = smov %s1647_s14  ;;  %s1951_s27 = smov %s1542_s28 }
 0x778   : > { %s1952_s28 = smov %s1954_s9  ;;  %19 = sbr.rel (!%p17_p5) target bundleno = 4 (0x4), region = 90 }
 0x77f   :  { %1037 = vsyncpa [#allocation5], 1 }
 0x780   :  { %1039 = vsyncpa [#allocation5 + $0x1], 1 }

</bundles_post_ra>
